<compile_context>
chip_gen: v7x
topology: tpu7x:2x2x1
jax: 0.10.0
libtpu: 0.0.40
codegen_flags: <defaults>
</compile_context>

<pallas_src>
import functools

import jax
import jax.numpy as jnp
from jax.experimental import pallas as pl
from jax.experimental.pallas import tpu as pltpu


def _round_up(x: int, m: int) -> int:
    return ((x + m - 1) // m) * m


def _cdiv(a: int, b: int) -> int:
    return -(-a // b)


def _make_mlp_kernel(n_linear: int, op_dtype):
    """n_linear Linear layers; ReLU after all but the last; f32 epilogue."""

    def kernel(x_ref, w0_ref, w_ref, b_ref, o_ref):
        # Layer 0: narrow-K matmul (tile_b, obs_dim_pad) @ (obs_dim_pad, D).
        h = jnp.dot(x_ref[...].astype(op_dtype), w0_ref[...],
                    preferred_element_type=jnp.float32)
        h = h + b_ref[0]                 # (1, D) f32 broadcast over rows
        h = jnp.maximum(h, 0.0)
        for l in range(1, n_linear):
            h = jnp.dot(h.astype(op_dtype), w_ref[l - 1],
                        preferred_element_type=jnp.float32)
            h = h + b_ref[l]
            if l < n_linear - 1:
                h = jnp.maximum(h, 0.0)  # no ReLU on the output layer
        o_ref[...] = h.astype(o_ref.dtype)

    return kernel


def pack_params(params, lane: int = 128, sub: int = 16, *, use_bf16: bool = True):
    """Pack list of (W (in,out), b (out,)) into zero-padded contiguous slabs.

    Returns:
      w0     : (obs_dim_pad, D)   layer-0 weight (op dtype)
      w_slab : (n-1, D, D)        remaining weights (op dtype)
      b_slab : (n, 1, D)          all biases (f32)
    Zero padding keeps the math exact: padded input features hit zero weight rows,
    padded hidden/output columns carry exactly-zero activations/logits.
    """
    op_dtype = jnp.bfloat16 if use_bf16 else jnp.float32
    n = len(params)
    w0_t, b0 = params[0]
    obs_dim = w0_t.shape[0]
    obs_dim_pad = _round_up(obs_dim, sub)

    d_max = w0_t.shape[1]
    for w, _ in params[1:]:
        d_max = max(d_max, w.shape[0], w.shape[1])
    D = _round_up(d_max, lane)

    w0 = jnp.zeros((obs_dim_pad, D), op_dtype)
    w0 = w0.at[:obs_dim, :w0_t.shape[1]].set(w0_t.astype(op_dtype))

    w_slab = jnp.zeros((max(n - 1, 0), D, D), op_dtype)
    b_slab = jnp.zeros((n, 1, D), jnp.float32)
    b_slab = b_slab.at[0, 0, :b0.reshape(-1).shape[0]].set(
        b0.reshape(-1).astype(jnp.float32))
    for i, (w, b) in enumerate(params[1:], start=1):
        w_slab = w_slab.at[i - 1, :w.shape[0], :w.shape[1]].set(w.astype(op_dtype))
        b_slab = b_slab.at[i, 0, :b.reshape(-1).shape[0]].set(
            b.reshape(-1).astype(jnp.float32))
    return w0, w_slab, b_slab


@functools.partial(jax.jit, static_argnames=("num_env", "tile_b_max"))
def classifier_forward(env_obs, w0, w_slab, b_slab, *, num_env: int,
                       tile_b_max: int = 2048):
    """env_obs: (B, obs_dim). w0: (obs_dim_pad, D). w_slab: (n-1, D, D). b_slab: (n, 1, D)."""
    B, obs_dim = env_obs.shape
    obs_dim_pad, D = w0.shape
    n_linear = b_slab.shape[0]
    op_dtype = w0.dtype  # bf16 or f32 matmul operands

    # Evenly split the batch so zero-row padding is < 1 sublane row per tile.
    n_tiles = max(1, _cdiv(B, tile_b_max))
    if B >= 256:
        n_tiles = max(n_tiles, 2)        # keep both v7x TensorCores busy
    tile_b = _round_up(_cdiv(B, n_tiles), 8)
    B_pad = tile_b * n_tiles

    # Narrow input pad only: (B_pad, obs_dim_pad), NOT a (B_pad, 128) slab.
    x = jnp.zeros((B_pad, obs_dim_pad), jnp.float32)
    x = x.at[:B, :obs_dim].set(env_obs.astype(jnp.float32))

    flops = 2 * B_pad * (obs_dim_pad * D + (n_linear - 1) * D * D)
    bytes_accessed = (x.size * 4
                      + w0.size * w0.dtype.itemsize
                      + w_slab.size * w_slab.dtype.itemsize
                      + b_slab.size * 4
                      + B_pad * D * 4)

    out = pl.pallas_call(
        _make_mlp_kernel(n_linear, op_dtype),
        out_shape=jax.ShapeDtypeStruct((B_pad, D), jnp.float32),
        grid=(n_tiles,),
        in_specs=[
            # activation tile streams over the batch grid axis
            pl.BlockSpec((tile_b, obs_dim_pad), lambda i: (i, 0)),
            # weight / bias slabs: constant block index -> VMEM-resident
            pl.BlockSpec((obs_dim_pad, D), lambda i: (0, 0)),
            pl.BlockSpec((n_linear - 1, D, D), lambda i: (0, 0, 0)),
            pl.BlockSpec((n_linear, 1, D), lambda i: (0, 0, 0)),
        ],
        out_specs=pl.BlockSpec((tile_b, D), lambda i: (i, 0)),
        compiler_params=pltpu.CompilerParams(
            dimension_semantics=("parallel",)),
        cost_estimate=pl.CostEstimate(
            flops=flops, transcendentals=0, bytes_accessed=bytes_accessed),
    )(x, w0, w_slab, b_slab)

    # Slice away batch padding and the lane padding on the logits.
    return out[:B, :num_env]


def init_params(key, obs_dim, hidden_dim, num_env, num_layers=3):
    """PyTorch-Linear-like uniform fan-in init; weights stored (in, out)."""
    dims = [(obs_dim, hidden_dim)]
    dims += [(hidden_dim, hidden_dim)] * (num_layers - 1)
    dims += [(hidden_dim, num_env)]
    params = []
    for (fan_in, fan_out) in dims:
        key, kw, kb = jax.random.split(key, 3)
        bound = 1.0 / jnp.sqrt(fan_in)
        w = jax.random.uniform(kw, (fan_in, fan_out), jnp.float32, -bound, bound)
        b = jax.random.uniform(kb, (fan_out,), jnp.float32, -bound, bound)
        params.append((w, b))
    return params


def reference_forward(env_obs, params):
    h = env_obs
    for i, (w, b) in enumerate(params):
        h = h @ w + b[None, :]
        if i < len(params) - 1:
            h = jnp.maximum(h, 0.0)
    return h


if __name__ == "__main__":
    # Classifier(env_obs_shape=[12], num_env=10, num_layers=3, hidden_dim=128)
    obs_dim, hidden_dim, num_env = 12, 128, 10

    key = jax.random.PRNGKey(0)
    key, kx1, kx2 = jax.random.split(key, 3)
    params = init_params(key, obs_dim, hidden_dim, num_env, num_layers=3)

    env_obs_a = jax.random.normal(kx1, (8, obs_dim), jnp.float32)
    env_obs_b = jax.random.normal(kx2, (40, obs_dim), jnp.float32)

    # --- exact f32 mode: bit-close to the PyTorch-style reference ---
    w0_f32, ws_f32, bs_f32 = pack_params(params, use_bf16=False)
    out_a = jax.block_until_ready(
        classifier_forward(env_obs_a, w0_f32, ws_f32, bs_f32, num_env=num_env))
    ref_a = reference_forward(env_obs_a, params)
    assert out_a.shape == (8, num_env), out_a.shape
    assert jnp.allclose(out_a, ref_a, atol=1e-4, rtol=1e-4), float(
        jnp.max(jnp.abs(out_a - ref_a)))

    # multi-tile grid + uneven batch (tile_b_max forced small to exercise the path)
    out_b = jax.block_until_ready(
        classifier_forward(env_obs_b, w0_f32, ws_f32, bs_f32, num_env=num_env,
                           tile_b_max=16))
    ref_b = reference_forward(env_obs_b, params)
    assert out_b.shape == (40, num_env), out_b.shape
    assert jnp.allclose(out_b, ref_b, atol=1e-4, rtol=1e-4), float(
        jnp.max(jnp.abs(out_b - ref_b)))

    # --- fast bf16-operand mode (f32 accumulate + f32 epilogue): looser tolerance ---
    w0_bf, ws_bf, bs_bf = pack_params(params, use_bf16=True)
    out_c = jax.block_until_ready(
        classifier_forward(env_obs_a, w0_bf, ws_bf, bs_bf, num_env=num_env))
    assert out_c.shape == (8, num_env), out_c.shape
    assert jnp.allclose(out_c, ref_a, atol=5e-2, rtol=5e-2), float(
        jnp.max(jnp.abs(out_c - ref_a)))

    print("KERNEL_OK")
</pallas_src>

<mosaic_0001>
module attributes {stable_mosaic.version = 11 : i64} {
  func.func @kernel(%arg0: i32, %arg1: memref<8x16xf32, #tpu.memory_space<vmem>>, %arg2: memref<16x128xf32, #tpu.memory_space<vmem>>, %arg3: memref<3x128x128xf32, #tpu.memory_space<vmem>>, %arg4: memref<4x1x128xf32, #tpu.memory_space<vmem>>, %arg5: memref<8x128xf32, #tpu.memory_space<vmem>>) attributes {dimension_semantics = [#tpu.dimension_semantics<parallel>], iteration_bounds = array<i64: 1>, scalar_prefetch = 0 : i64, scratch_operands = 0 : i64, tpu.core_type = #tpu.core_type<tc>, window_params = [{transform_indices = @transform_0, window_bounds = array<i64: 8, 16>}, {pipeline_mode = #tpu.pipeline_mode<synchronous>, transform_indices = @transform_1, window_bounds = array<i64: 16, 128>}, {pipeline_mode = #tpu.pipeline_mode<synchronous>, transform_indices = @transform_2, window_bounds = array<i64: 3, 128, 128>}, {pipeline_mode = #tpu.pipeline_mode<synchronous>, transform_indices = @transform_3, window_bounds = array<i64: 4, 1, 128>}, {transform_indices = @transform_4, window_bounds = array<i64: 8, 128>}]} {
    %c0 = arith.constant 0 : index
    %c0_0 = arith.constant 0 : index
    %0 = vector.load %arg1[%c0, %c0_0] : memref<8x16xf32, #tpu.memory_space<vmem>>, vector<8x16xf32>
    %c0_1 = arith.constant 0 : index
    %c0_2 = arith.constant 0 : index
    %1 = vector.load %arg2[%c0_1, %c0_2] : memref<16x128xf32, #tpu.memory_space<vmem>>, vector<16x128xf32>
    %cst = arith.constant dense<0.000000e+00> : vector<8x128xf32>
    %2 = tpu.matmul %0, %1, %cst {dimension_numbers = #tpu.dot_dimension_numbers<[1], [0], [0], [1], [0, 0, 1, 1], [], []>} : vector<8x16xf32>, vector<16x128xf32>, vector<8x128xf32> -> vector<8x128xf32>
    %c0_3 = arith.constant 0 : index
    %c0_4 = arith.constant 0 : index
    %c0_5 = arith.constant 0 : index
    %3 = vector.load %arg4[%c0_3, %c0_4, %c0_5] : memref<4x1x128xf32, #tpu.memory_space<vmem>>, vector<1x1x128xf32>
    %4 = vector.shape_cast %3 : vector<1x1x128xf32> to vector<1x128xf32>
    %5 = vector.broadcast %4 : vector<1x128xf32> to vector<8x128xf32>
    %6 = arith.addf %2, %5 : vector<8x128xf32>
    %cst_6 = arith.constant 0.000000e+00 : f32
    %7 = vector.broadcast %cst_6 : f32 to vector<8x128xf32>
    %8 = arith.maximumf %6, %7 : vector<8x128xf32>
    %c0_7 = arith.constant 0 : index
    %c0_8 = arith.constant 0 : index
    %c0_9 = arith.constant 0 : index
    %9 = vector.load %arg3[%c0_7, %c0_8, %c0_9] : memref<3x128x128xf32, #tpu.memory_space<vmem>>, vector<1x128x128xf32>
    %10 = vector.shape_cast %9 : vector<1x128x128xf32> to vector<128x128xf32>
    %cst_10 = arith.constant dense<0.000000e+00> : vector<8x128xf32>
    %11 = tpu.matmul %8, %10, %cst_10 {dimension_numbers = #tpu.dot_dimension_numbers<[1], [0], [0], [1], [0, 0, 1, 1], [], []>} : vector<8x128xf32>, vector<128x128xf32>, vector<8x128xf32> -> vector<8x128xf32>
    %c1 = arith.constant 1 : index
    %c0_11 = arith.constant 0 : index
    %c0_12 = arith.constant 0 : index
    %12 = vector.load %arg4[%c1, %c0_11, %c0_12] : memref<4x1x128xf32, #tpu.memory_space<vmem>>, vector<1x1x128xf32>
    %13 = vector.shape_cast %12 : vector<1x1x128xf32> to vector<1x128xf32>
    %14 = vector.broadcast %13 : vector<1x128xf32> to vector<8x128xf32>
    %15 = arith.addf %11, %14 : vector<8x128xf32>
    %cst_13 = arith.constant 0.000000e+00 : f32
    %16 = vector.broadcast %cst_13 : f32 to vector<8x128xf32>
    %17 = arith.maximumf %15, %16 : vector<8x128xf32>
    %c1_14 = arith.constant 1 : index
    %c0_15 = arith.constant 0 : index
    %c0_16 = arith.constant 0 : index
    %18 = vector.load %arg3[%c1_14, %c0_15, %c0_16] : memref<3x128x128xf32, #tpu.memory_space<vmem>>, vector<1x128x128xf32>
    %19 = vector.shape_cast %18 : vector<1x128x128xf32> to vector<128x128xf32>
    %cst_17 = arith.constant dense<0.000000e+00> : vector<8x128xf32>
    %20 = tpu.matmul %17, %19, %cst_17 {dimension_numbers = #tpu.dot_dimension_numbers<[1], [0], [0], [1], [0, 0, 1, 1], [], []>} : vector<8x128xf32>, vector<128x128xf32>, vector<8x128xf32> -> vector<8x128xf32>
    %c2 = arith.constant 2 : index
    %c0_18 = arith.constant 0 : index
    %c0_19 = arith.constant 0 : index
    %21 = vector.load %arg4[%c2, %c0_18, %c0_19] : memref<4x1x128xf32, #tpu.memory_space<vmem>>, vector<1x1x128xf32>
    %22 = vector.shape_cast %21 : vector<1x1x128xf32> to vector<1x128xf32>
    %23 = vector.broadcast %22 : vector<1x128xf32> to vector<8x128xf32>
    %24 = arith.addf %20, %23 : vector<8x128xf32>
    %cst_20 = arith.constant 0.000000e+00 : f32
    %25 = vector.broadcast %cst_20 : f32 to vector<8x128xf32>
    %26 = arith.maximumf %24, %25 : vector<8x128xf32>
    %c2_21 = arith.constant 2 : index
    %c0_22 = arith.constant 0 : index
    %c0_23 = arith.constant 0 : index
    %27 = vector.load %arg3[%c2_21, %c0_22, %c0_23] : memref<3x128x128xf32, #tpu.memory_space<vmem>>, vector<1x128x128xf32>
    %28 = vector.shape_cast %27 : vector<1x128x128xf32> to vector<128x128xf32>
    %cst_24 = arith.constant dense<0.000000e+00> : vector<8x128xf32>
    %29 = tpu.matmul %26, %28, %cst_24 {dimension_numbers = #tpu.dot_dimension_numbers<[1], [0], [0], [1], [0, 0, 1, 1], [], []>} : vector<8x128xf32>, vector<128x128xf32>, vector<8x128xf32> -> vector<8x128xf32>
    %c3 = arith.constant 3 : index
    %c0_25 = arith.constant 0 : index
    %c0_26 = arith.constant 0 : index
    %30 = vector.load %arg4[%c3, %c0_25, %c0_26] : memref<4x1x128xf32, #tpu.memory_space<vmem>>, vector<1x1x128xf32>
    %31 = vector.shape_cast %30 : vector<1x1x128xf32> to vector<1x128xf32>
    %32 = vector.broadcast %31 : vector<1x128xf32> to vector<8x128xf32>
    %33 = arith.addf %29, %32 : vector<8x128xf32>
    %c0_27 = arith.constant 0 : index
    %c0_28 = arith.constant 0 : index
    %34 = vector.load %arg5[%c0_27, %c0_28] : memref<8x128xf32, #tpu.memory_space<vmem>>, vector<8x128xf32>
    tpu.vector_store %arg5[%c0_27, %c0_28], %33 {strides = array<i32>} : memref<8x128xf32, #tpu.memory_space<vmem>>, vector<8x128xf32>,
    return
  }
  func.func @transform_0(%arg0: i32) -> (i32, i32) {
    %c0_i32 = arith.constant 0 : i32
    %c0_i32_0 = arith.constant 0 : i32
    return %arg0, %c0_i32 : i32, i32
  }
  func.func @transform_1(%arg0: i32) -> (i32, i32) {
    %c0_i32 = arith.constant 0 : i32
    %c0_i32_0 = arith.constant 0 : i32
    %c0_i32_1 = arith.constant 0 : i32
    return %c0_i32, %c0_i32_0 : i32, i32
  }
  func.func @transform_2(%arg0: i32) -> (i32, i32, i32) {
    %c0_i32 = arith.constant 0 : i32
    %c0_i32_0 = arith.constant 0 : i32
    %c0_i32_1 = arith.constant 0 : i32
    %c0_i32_2 = arith.constant 0 : i32
    return %c0_i32, %c0_i32_0, %c0_i32_1 : i32, i32, i32
  }
  func.func @transform_3(%arg0: i32) -> (i32, i32, i32) {
    %c0_i32 = arith.constant 0 : i32
    %c0_i32_0 = arith.constant 0 : i32
    %c0_i32_1 = arith.constant 0 : i32
    %c0_i32_2 = arith.constant 0 : i32
    return %c0_i32, %c0_i32_0, %c0_i32_1 : i32, i32, i32
  }
  func.func @transform_4(%arg0: i32) -> (i32, i32) {
    %c0_i32 = arith.constant 0 : i32
    %c0_i32_0 = arith.constant 0 : i32
    return %arg0, %c0_i32 : i32, i32
  }
}

</mosaic_0001>

<bundles_post_ra>
// kernel: classifier_forward.1
= control target key start
LH: loop header
LB: loop body
LE: loop exit
PB: predicated region body
PF: predicated region fallthrough
CT: control target
= control target key end

     0   :  { %9 = vsyncpa [#allocation3], 0  ;;  %s833_s0 = inlined_call_operand.vmem [shape: f32[8,16], index: 0, kind: input, shape index: {}]   ;;  %s834_s1 = inlined_call_operand.vmem [shape: f32[16,128], index: 1, kind: input, shape index: {}]   ;;  %s835_s2 = inlined_call_operand.hbm [shape: f32[3,128,128], index: 2, kind: input, shape index: {}]   ;;  %s836_s3 = inlined_call_operand.vmem [shape: f32[4,1,128], index: 3, kind: input, shape index: {}]   ;;  %s837_s4 = inlined_call_operand.hbm [shape: f32[8,128], index: 4, kind: output, shape index: {}]  }
   0x1   :  { %10 = vsyncpa [#allocation4], 0  ;;  %s723_s15 = smov [#allocation2]   ;;  %s675_s19 = scalar_lea.hbm %s835_s2, 6144 }
   0x2   :  { %s20_s16 = sshll.u32 %s723_s15, 4  ;;  %p676_p0 = scmp.ne.s32.totalorder %s835_s2, %s675_s19  ;;  %s21_s16 = int_to_ptr.vmem [resolvable:$true] %s20_s16 }
   0x3   :  { %p679_p1 = scmp.lt.u32.totalorder %s675_s19, %s835_s2 }
   0x5   :  { %p681_p2 = pnand %p679_p1, %p676_p0 }
   0x7   :  { %684 = shalt.err (!%p681_p2)
}
   0x8   :  { %s685_s24 = scalar_lea.vmem %s21_s16, 6144  ;;  %p690_p4 = scmp.lt.s32.totalorder %s21_s16, %s21_s16 }
   0x9   :  { %p686_p3 = scmp.ne.s32.totalorder %s21_s16, %s685_s24  ;;  %p691_p5 = scmp.lt.s32.totalorder %s685_s24, %s685_s24 }
   0xb   :  { %p692_p6 = por %p691_p5, %p690_p4 }
   0xd   :  { %p693_p7 = pnand %p692_p6, %p686_p3 }
   0xf   :  { %696 = shalt.err (!%p693_p7)
}
  0x10   :  { %s724_s25 = smov 128   ;;  %s725_s26 = smov 8  }
  0x11   :  { %26 = dma.hbm_to_vmem [thread:$0]  %s835_s2, 6144, %s21_s16, [#allocation3], %s724_s25, %s724_s25, %s725_s26  }
  0x12   :  { %719 = dma.done.wait [#allocation3], 6144  }
  0x13   :  { %720 = vsyncadd [#allocation3], 4294961152  ;;  %v726_v0 = vmov 0.0|0.0   ;;  %vm727_vm0 = vmmov 0   ;;  %v728_v1 = vmov 0.0   ;;  %v33_v2 = vld [vmem:[%s834_s1] sm:$0xff] }
  0x14   :  { %593 = vmatprep.subr.bf16.mxu0 %v726_v0  ;;  %485 = vmatprep.mubr.msk.f32.mxu0 %vm727_vm0, %v728_v1  ;;  %v34_v3 = vld [vmem:[%s834_s1 + $0x8] sm:$0xff]  ;;  %v117_v5 = vld [vmem:[#allocation2] sm:$0xff]  ;;  %v119_v7 = vld [vmem:[#allocation2 + $0x10] sm:$0xff]  ;;  %vm42_vm1 = vcmask 130048   ;;  %s729_s14 = smov [#allocation5]  }
  0x15   :  { %596 = vmatprep.subr.bf16.mxu1 %v726_v0  ;;  %520 = vmatprep.mubr.msk.f32.mxu1 %vm727_vm0, %v728_v1  ;;  %v594_v4 = vpack.c.bf16 %v34_v3, %v33_v2  ;;  %v118_v6 = vld [vmem:[#allocation2 + $0x8] sm:$0xff]  ;;  %v120_v9 = vld [vmem:[#allocation2 + $0x18] sm:$0xff]  ;;  %v32_v10 = vld [vmem:[%s833_s0] sm:$0xff]  ;;  %s410_s15 = sshll.u32 %s729_s14, 4  ;;  %s411_s15 = int_to_ptr.vmem [resolvable:$true] %s410_s15 }
  0x16   :  { %v597_v8 = vpack.c.bf16 %v118_v6, %v117_v5  ;;  %v600_v11 = vpack.c.bf16 %v120_v9, %v119_v7  ;;  %v121_v12 = vld [vmem:[#allocation2 + $0x20] sm:$0xff]  ;;  %v122_v13 = vld [vmem:[#allocation2 + $0x28] sm:$0xff]  ;;  %v123_v15 = vld [vmem:[#allocation2 + $0x30] sm:$0xff]  ;;  %s697_s16 = scalar_lea.vmem %s411_s15, 128  ;;  %p702_p9 = scmp.lt.s32.totalorder %s411_s15, %s411_s15 }
  0x17   :  { %595 = vmatpush3.bf16.msra.mxu0 %v594_v4  ;;  %v603_v14 = vpack.c.bf16 %v122_v13, %v121_v12  ;;  %v124_v16 = vld [vmem:[#allocation2 + $0x38] sm:$0xff]  ;;  %v125_v18 = vld [vmem:[#allocation2 + $0x40] sm:$0xff]  ;;  %v126_v19 = vld [vmem:[#allocation2 + $0x48] sm:$0xff]  ;;  %p698_p8 = scmp.ne.s32.totalorder %s411_s15, %s697_s16  ;;  %p703_p10 = scmp.lt.s32.totalorder %s697_s16, %s697_s16 }
  0x18   :  { %598 = vmatpush3.bf16.msra.mxu1 %v597_v8  ;;  %620 = vmatprep.subr.bf16.mxu0 %v726_v0  ;;  %v606_v17 = vpack.c.bf16 %v124_v16, %v123_v15  ;;  %v609_v20 = vpack.c.bf16 %v126_v19, %v125_v18  ;;  %v127_v21 = vld [vmem:[#allocation2 + $0x50] sm:$0xff]  ;;  %v128_v22 = vld [vmem:[#allocation2 + $0x58] sm:$0xff]  ;;  %v129_v24 = vld [vmem:[#allocation2 + $0x60] sm:$0xff] }
  0x19   :  { %599 = vmatprep.subr.bf16.mxu1 %v726_v0  ;;  %v612_v23 = vpack.c.bf16 %v128_v22, %v127_v21  ;;  %v130_v25 = vld [vmem:[#allocation2 + $0x68] sm:$0xff]  ;;  %v131_v27 = vld [vmem:[#allocation2 + $0x70] sm:$0xff]  ;;  %v132_v28 = vld [vmem:[#allocation2 + $0x78] sm:$0xff]  ;;  %p704_p11 = por %p703_p10, %p702_p9 }
  0x1a   :  { %486 = vmatmul.mubr.msk.f32.vlgmr.msra.gmra.mrb[0].mxu0 %vm42_vm1, %v32_v10  ;;  %v615_v26 = vpack.c.bf16 %v130_v25, %v129_v24  ;;  %v618_v29 = vpack.c.bf16 %v132_v28, %v131_v27  ;;  %v213_v30 = vld [vmem:[#allocation2 + $0x80] sm:$0xff]  ;;  %v214_v31 = vld [vmem:[#allocation2 + $0x88] sm:$0xff]  ;;  %v215_v32 = vld [vmem:[#allocation2 + $0x90] sm:$0xff] }
  0x1b   :  { %555 = vmatprep.mubr.msk.f32.mxu0 %vm727_vm0, %v728_v1  ;;  %v621_v33 = vpack.c.bf16 %v214_v31, %v213_v30  ;;  %v216_v34 = vld [vmem:[#allocation2 + $0x98] sm:$0xff]  ;;  %v217_v36 = vld [vmem:[#allocation2 + $0xa0] sm:$0xff]  ;;  %v218_v37 = vld [vmem:[#allocation2 + $0xa8] sm:$0xff]  ;;  %p705_p12 = pnand %p704_p11, %p698_p8 }
  0x1c   :  { %601 = vmatpush3.bf16.msra.mxu1 %v600_v11  ;;  %v624_v35 = vpack.c.bf16 %v216_v34, %v215_v32  ;;  %v627_v38 = vpack.c.bf16 %v218_v37, %v217_v36  ;;  %v219_v39 = vld [vmem:[#allocation2 + $0xb0] sm:$0xff]  ;;  %v220_v40 = vld [vmem:[#allocation2 + $0xb8] sm:$0xff]  ;;  %v221_v42 = vld [vmem:[#allocation2 + $0xc0] sm:$0xff] }
  0x1d   :  { %602 = vmatprep.subr.bf16.mxu1 %v726_v0  ;;  %622 = vmatpush3.bf16.msra.mxu0 %v621_v33  ;;  %v630_v41 = vpack.c.bf16 %v220_v40, %v219_v39  ;;  %v222_v43 = vld [vmem:[#allocation2 + $0xc8] sm:$0xff]  ;;  %v223_v45 = vld [vmem:[#allocation2 + $0xd0] sm:$0xff]  ;;  %v224_v46 = vld [vmem:[#allocation2 + $0xd8] sm:$0xff] }
  0x1e   :  { %623 = vmatprep.subr.bf16.mxu0 %v726_v0  ;;  %v633_v44 = vpack.c.bf16 %v222_v43, %v221_v42  ;;  %v636_v47 = vpack.c.bf16 %v224_v46, %v223_v45  ;;  %v225_v48 = vld [vmem:[#allocation2 + $0xe0] sm:$0xff]  ;;  %v226_v49 = vld [vmem:[#allocation2 + $0xe8] sm:$0xff]  ;;  %v227_v56 = vld [vmem:[#allocation2 + $0xf0] sm:$0xff] }
  0x1f   :  { %v639_v50 = vpack.c.bf16 %v226_v49, %v225_v48  ;;  %v419_v51 = vld [vmem:[%s836_s3] ss:$0 sm:$0xff]  ;;  %v228_v57 = vld [vmem:[#allocation2 + $0xf8] sm:$0xff]  ;;  %v310_v60 = vld [vmem:[#allocation2 + $0x108] sm:$0xff] }
  0x20   :  { %604 = vmatpush3.bf16.msra.mxu1 %v603_v14  ;;  %v642_v58 = vpack.c.bf16 %v228_v57, %v227_v56  ;;  %v309_v59 = vld [vmem:[#allocation2 + $0x100] sm:$0xff]  ;;  %v311_v61 = vld [vmem:[#allocation2 + $0x110] sm:$0xff]  ;;  %v312_v63 = vld [vmem:[#allocation2 + $0x118] sm:$0xff] }
  0x21   :  { %605 = vmatprep.subr.bf16.mxu1 %v726_v0  ;;  %625 = vmatpush3.bf16.msra.mxu0 %v624_v35  ;;  %v645_v62 = vpack.c.bf16 %v310_v60, %v309_v59  ;;  %v648_v2 = vpack.c.bf16 %v312_v63, %v311_v61  ;;  %v313_v3 = vld [vmem:[#allocation2 + $0x120] sm:$0xff]  ;;  %v314_v4 = vld [vmem:[#allocation2 + $0x128] sm:$0xff]  ;;  %v316_v6 = vld [vmem:[#allocation2 + $0x138] sm:$0xff] }
  0x22   :  { %626 = vmatprep.subr.bf16.mxu0 %v726_v0  ;;  %v651_v5 = vpack.c.bf16 %v314_v4, %v313_v3  ;;  %v317_v8 = vld [vmem:[#allocation2 + $0x140] sm:$0xff]  ;;  %v318_v9 = vld [vmem:[#allocation2 + $0x148] sm:$0xff]  ;;  %v319_v11 = vld [vmem:[#allocation2 + $0x150] sm:$0xff] }
  0x23   :  { %v657_v10 = vpack.c.bf16 %v318_v9, %v317_v8  ;;  %v320_v12 = vld [vmem:[#allocation2 + $0x158] sm:$0xff]  ;;  %v321_v14 = vld [vmem:[#allocation2 + $0x160] sm:$0xff]  ;;  %v322_v15 = vld [vmem:[#allocation2 + $0x168] sm:$0xff] }
  0x24   :  { %607 = vmatpush3.bf16.msra.mxu1 %v606_v17  ;;  %v660_v13 = vpack.c.bf16 %v320_v12, %v319_v11  ;;  %v663_v16 = vpack.c.bf16 %v322_v15, %v321_v14  ;;  %v422_v17 = vld [vmem:[%s836_s3 + $0x1] ss:$0 sm:$0xff]  ;;  %v323_v22 = vld [vmem:[#allocation2 + $0x170] sm:$0xff]  ;;  %v424_v25 = vld [vmem:[%s836_s3 + $0x2] ss:$0 sm:$0xff] }
  0x25   :  { %608 = vmatprep.subr.bf16.mxu1 %v726_v0  ;;  %628 = vmatpush3.bf16.msra.mxu0 %v627_v38 }
  0x26   :  { %629 = vmatprep.subr.bf16.mxu0 %v726_v0 }
  0x28   :  { %610 = vmatpush3.bf16.msra.mxu1 %v609_v20 }
  0x29   :  { %611 = vmatprep.subr.bf16.mxu1 %v726_v0  ;;  %631 = vmatpush3.bf16.msra.mxu0 %v630_v41 }
  0x2a   :  { %632 = vmatprep.subr.bf16.mxu0 %v726_v0 }
  0x2c   :  { %613 = vmatpush3.bf16.msra.mxu1 %v612_v23  ;;  %v324_v23 = vld [vmem:[#allocation2 + $0x178] sm:$0xff] }
  0x2d   :  { %614 = vmatprep.subr.bf16.mxu1 %v726_v0  ;;  %634 = vmatpush3.bf16.msra.mxu0 %v633_v44  ;;  %v666_v24 = vpack.c.bf16 %v324_v23, %v323_v22 }
  0x2e   :  { %635 = vmatprep.subr.bf16.mxu0 %v726_v0 }
  0x30   :  { %616 = vmatpush3.bf16.msra.mxu1 %v615_v26 }
  0x31   :  { %617 = vmatprep.subr.bf16.mxu1 %v726_v0  ;;  %637 = vmatpush3.bf16.msra.mxu0 %v636_v47 }
  0x32   :  { %638 = vmatprep.subr.bf16.mxu0 %v726_v0 }
  0x34   :  { %619 = vmatpush3.bf16.msra.mxu1 %v618_v29  ;;  %v426_v29 = vld [vmem:[%s836_s3 + $0x3] ss:$0 sm:$0xff] }
  0x35   :  { %644 = vmatprep.subr.bf16.mxu1 %v726_v0  ;;  %640 = vmatpush3.bf16.msra.mxu0 %v639_v50 }
  0x36   :  { %641 = vmatprep.subr.bf16.mxu0 %v726_v0 }
  0x39   :  { %643 = vmatpush3.bf16.msra.mxu0 %v642_v58 }
  0xed   :  { %v112_v52 = vpop.f32.mrb[0].mxu0 }
  0xee   :  { %v113_v53 = vadd.f32 %v419_v51, %v112_v52  ;;  %v487_v54 = vpop.f32.mrb[1].mxu0 }
  0xf0   :  { %v116_v55 = vmax.f32 %v113_v53, 0.0 }
  0xf2   :  { %521 = vmatmul.mubr.f32.vlgmr.msra.gmra.mrb[0].mxu1 %v116_v55 }
  0xf3   :  { %590 = vmatprep.mubr.msk.f32.mxu1 %vm727_vm0, %v728_v1  ;;  %646 = vmatpush3.bf16.msra.mxu1 %v645_v62  ;;  %v315_v1 = vld [vmem:[#allocation2 + $0x130] sm:$0xff] }
  0xf4   :  { %647 = vmatprep.subr.bf16.mxu1 %v726_v0  ;;  %v654_v7 = vpack.c.bf16 %v316_v6, %v315_v1 }
  0xf7   :  { %649 = vmatpush3.bf16.msra.mxu1 %v648_v2 }
  0xf8   :  { %650 = vmatprep.subr.bf16.mxu1 %v726_v0 }
  0xfb   :  { %652 = vmatpush3.bf16.msra.mxu1 %v651_v5 }
  0xfc   :  { %653 = vmatprep.subr.bf16.mxu1 %v726_v0 }
  0xff   :  { %655 = vmatpush3.bf16.msra.mxu1 %v654_v7 }
 0x100   :  { %656 = vmatprep.subr.bf16.mxu1 %v726_v0 }
 0x103   :  { %658 = vmatpush3.bf16.msra.mxu1 %v657_v10 }
 0x104   :  { %659 = vmatprep.subr.bf16.mxu1 %v726_v0 }
 0x107   :  { %661 = vmatpush3.bf16.msra.mxu1 %v660_v13 }
 0x108   :  { %662 = vmatprep.subr.bf16.mxu1 %v726_v0 }
 0x10b   :  { %664 = vmatpush3.bf16.msra.mxu1 %v663_v16 }
 0x10c   :  { %665 = vmatprep.subr.bf16.mxu1 %v726_v0 }
 0x10f   :  { %667 = vmatpush3.bf16.msra.mxu1 %v666_v24 }
 0x1c5   :  { %v207_v18 = vpop.f32.mrb[0].mxu1 }
 0x1c6   :  { %v208_v19 = vadd.f32 %v422_v17, %v207_v18  ;;  %v522_v20 = vpop.f32.mrb[1].mxu1 }
 0x1c8   :  { %v211_v21 = vmax.f32 %v208_v19, 0.0 }
 0x1ca   :  { %556 = vmatmul.mubr.f32.vlgmr.msra.gmra.mrb[2].mxu0 %v211_v21 }
 0x29d   :  { %v303_v26 = vpop.f32.mrb[2].mxu0 }
 0x29e   :  { %v304_v27 = vadd.f32 %v424_v25, %v303_v26  ;;  %v557_v0 = vpop.f32.mrb[3].mxu0 }
 0x2a0   :  { %v307_v28 = vmax.f32 %v304_v27, 0.0 }
 0x2a2   :  { %591 = vmatmul.mubr.f32.vlgmr.msra.gmra.mrb[2].mxu1 %v307_v28 }
 0x375   :  { %v399_v30 = vpop.f32.mrb[2].mxu1 }
 0x376   :  { %v400_v31 = vadd.f32 %v426_v29, %v399_v30  ;;  %v592_v32 = vpop.f32.mrb[3].mxu1 }
 0x378   :  { %403 = vst [vmem:[#allocation5] sm:$0xff] %v400_v31 }
 0x379   :  { %708 = shalt.err (!%p705_p12)
}
 0x37a   :  { %s709_s19 = scalar_lea.hbm %s837_s4, 128 }
 0x37b   :  { %p710_p13 = scmp.ne.s32.totalorder %s837_s4, %s709_s19  ;;  %p713_p0 = scmp.lt.u32.totalorder %s709_s19, %s837_s4 }
 0x37d   :  { %p715_p1 = pnand %p713_p0, %p710_p13 }
 0x37f   :  { %718 = shalt.err (!%p715_p1)
}
 0x380   :  { %413 = dma.vmem_to_hbm [thread:$0]  %s411_s15, 128, %s837_s4, [#allocation4]  }
 0x381   :  { %721 = dma.done.wait [#allocation4], 128  }
 0x382   :  { %722 = vsyncadd [#allocation4], 4294967168 }
 0x383   :  { %417 = vsyncpa [#allocation3], 1 }
 0x384   :  { %418 = vsyncpa [#allocation4], 1 }

</bundles_post_ra>
